<compile_context>
chip_gen: v7x
topology: tpu7x:2x2x1
jax: 0.10.0
libtpu: 0.0.40
codegen_flags: <defaults>
</compile_context>

<pallas_src>
import functools

import jax
import jax.numpy as jnp
from jax import lax
from jax.experimental import pallas as pl
from jax.experimental.pallas import tpu as pltpu


def _round_up(x, m):
    return (x + m - 1) // m * m


def _largest_tile(total, cap, step):
    """Largest multiple-of-`step` divisor of `total` that is <= cap (total % step == 0)."""
    t = min(cap, total)
    t -= t % step
    while total % t != 0:
        t -= step
    return t


# ----------------------- Pallas kernels -----------------------

def _conv_stats_kernel(a_ref, b_ref, o_ref, s1_ref, s2_ref, acc_ref):
    # grid = (oc_tiles, m_tiles, k_tiles). k is the matmul reduction; m is "arbitrary"
    # because the BN statistics (s1, s2) accumulate across it.
    i = pl.program_id(1)          # M tile
    k = pl.program_id(2)          # K tile
    nk = pl.num_programs(2)

    @pl.when(k == 0)
    def _():
        acc_ref[...] = jnp.zeros_like(acc_ref)

    acc_ref[...] += jnp.dot(a_ref[...], b_ref[...],
                            preferred_element_type=jnp.float32)

    @pl.when(k == nk - 1)
    def _():
        y = acc_ref[...]
        o_ref[...] = y.astype(o_ref.dtype)
        # Padded rows of A are exactly zero -> y is zero there -> they contribute
        # nothing to the sums; the wrapper divides by the number of VALID rows.
        ps1 = jnp.sum(y, axis=0, keepdims=True)
        ps2 = jnp.sum(y * y, axis=0, keepdims=True)

        @pl.when(i == 0)
        def _():
            s1_ref[...] = ps1
            s2_ref[...] = ps2

        @pl.when(i > 0)
        def _():
            s1_ref[...] += ps1
            s2_ref[...] += ps2


def _bn_apply_kernel(y_ref, scale_ref, shift_ref, o_ref, *, activation):
    # out = y * (gamma * inv_std) + (beta - mean * gamma * inv_std)  -> single FMA/elem
    out = y_ref[...].astype(jnp.float32) * scale_ref[...] + shift_ref[...]
    if activation:
        out = jnp.maximum(out, 0.0)
    o_ref[...] = out.astype(o_ref.dtype)


# ----------------------- wrappers -----------------------

def bn_conv2d_nhwc(x, weight, gamma, beta, *, stride, padding, dilation=1, groups=1,
                   activation=True, eps=1e-5, out_dtype=None):
    """BN_Conv2d forward. x: (N, H, W, C) channels-last; weight: (OC, IC, KH, KW)
    (PyTorch layout). Returns (N, OH, OW, OC)."""
    assert groups == 1  # TODO(synk): grouped convolution (groups > 1) not implemented
    # TODO(synk): conv bias path not implemented (module default is bias=False)

    N, H, W, C = x.shape
    OC, Cw, KH, KW = weight.shape
    assert Cw == C
    if out_dtype is None:
        out_dtype = x.dtype

    to2 = lambda v: (v, v) if isinstance(v, int) else tuple(v)
    sh, sw = to2(stride)
    ph, pw = to2(padding)
    dh, dw = to2(dilation)
    OH = (H + 2 * ph - dh * (KH - 1) - 1) // sh + 1
    OW = (W + 2 * pw - dw * (KW - 1) - 1) // sw + 1
    M = N * OH * OW
    K = C * KH * KW

    # ---- patches (plain-JAX glue, channels-last K ordering = (KH, KW, C)) ----
    if KH == 1 and KW == 1 and ph == 0 and pw == 0:
        # 1x1 conv fast path: no im2col at all (majority of GoogleNet convs).
        xs = x if (sh == 1 and sw == 1) else \
            x[:, :(OH - 1) * sh + 1:sh, :(OW - 1) * sw + 1:sw, :]
        patches = xs.reshape(M, C)
    else:
        xp = jnp.pad(x, ((0, 0), (ph, ph), (pw, pw), (0, 0)))
        cols = []
        for ki in range(KH):
            for kj in range(KW):
                h0, w0 = ki * dh, kj * dw
                cols.append(xp[:, h0:h0 + (OH - 1) * sh + 1:sh,
                               w0:w0 + (OW - 1) * sw + 1:sw, :])
        # (N, OH, OW, KH*KW, C) -> (M, KH*KW*C)
        patches = jnp.stack(cols, axis=3).reshape(M, KH * KW * C)
        # TODO(synk): for large 3x3/5x5 layers, build patch tiles in-kernel instead of
        # materializing the bf16 im2col matrix in HBM.
    w_mat = weight.transpose(2, 3, 1, 0).reshape(K, OC)   # same (KH, KW, C) K ordering

    # ---- tiling: bf16 operands, f32 accumulation; sized for v7x's 32 MiB scoped VMEM ----
    tm = 256
    tn = 256 if _round_up(OC, 128) % 256 == 0 else 128
    tk = min(512, _round_up(K, 128))
    M_pad = _round_up(M, tm)
    K_pad = _round_up(K, tk)
    OC_pad = _round_up(OC, tn)

    a = jnp.pad(patches.astype(jnp.bfloat16), ((0, M_pad - M), (0, K_pad - K)))
    b = jnp.pad(w_mat.astype(jnp.bfloat16), ((0, K_pad - K), (0, OC_pad - OC)))

    nj, ni, nk = OC_pad // tn, M_pad // tm, K_pad // tk

    conv_out, s1, s2 = pl.pallas_call(
        _conv_stats_kernel,
        out_shape=(jax.ShapeDtypeStruct((M_pad, OC_pad), jnp.bfloat16),
                   jax.ShapeDtypeStruct((1, OC_pad), jnp.float32),
                   jax.ShapeDtypeStruct((1, OC_pad), jnp.float32)),
        grid=(nj, ni, nk),
        in_specs=[pl.BlockSpec((tm, tk), lambda j, i, k: (i, k)),
                  pl.BlockSpec((tk, tn), lambda j, i, k: (k, j))],
        out_specs=[pl.BlockSpec((tm, tn), lambda j, i, k: (i, j)),
                   pl.BlockSpec((1, tn), lambda j, i, k: (0, j)),
                   pl.BlockSpec((1, tn), lambda j, i, k: (0, j))],
        scratch_shapes=[pltpu.VMEM((tm, tn), jnp.float32)],
        compiler_params=pltpu.CompilerParams(
            # OC tiles are independent (megacore-parallel); M is "arbitrary" because the
            # BN stats accumulate across it; K is the matmul reduction (last, arbitrary).
            dimension_semantics=("parallel", "arbitrary", "arbitrary")),
        cost_estimate=pl.CostEstimate(
            flops=2 * M_pad * K_pad * OC_pad,
            transcendentals=0,
            bytes_accessed=a.size * 2 + b.size * 2 + M_pad * OC_pad * 2 + OC_pad * 8),
    )(a, b)

    # ---- per-channel scale/shift (tiny (1, OC_pad) vectors -> plain JAX glue) ----
    inv_m = jnp.float32(1.0 / M)
    mean = s1 * inv_m
    var = jnp.maximum(s2 * inv_m - mean * mean, 0.0)   # biased var (PyTorch training BN)
    # TODO(synk): single-pass E[x^2]-E[x]^2 loses precision for huge M / large means; a
    #             two-pass (re-read conv_out) or Welford variant would be more robust.
    inv_std = lax.rsqrt(var + jnp.float32(eps))
    g = jnp.zeros((1, OC_pad), jnp.float32).at[0, :OC].set(gamma.astype(jnp.float32))
    bt = jnp.zeros((1, OC_pad), jnp.float32).at[0, :OC].set(beta.astype(jnp.float32))
    scale = g * inv_std
    shift = bt - mean * scale

    # ---- normalize + ReLU, tiled over M so any real GoogleNet layer fits VMEM ----
    tm_bn = _largest_tile(M_pad, 1024, tm)
    tn_bn = _largest_tile(OC_pad, 512, tn)
    bn_fn = functools.partial(_bn_apply_kernel, activation=activation)
    y = pl.pallas_call(
        bn_fn,
        out_shape=jax.ShapeDtypeStruct((M_pad, OC_pad), out_dtype),
        grid=(M_pad // tm_bn, OC_pad // tn_bn),
        in_specs=[pl.BlockSpec((tm_bn, tn_bn), lambda i, j: (i, j)),
                  pl.BlockSpec((1, tn_bn), lambda i, j: (0, j)),
                  pl.BlockSpec((1, tn_bn), lambda i, j: (0, j))],
        out_specs=pl.BlockSpec((tm_bn, tn_bn), lambda i, j: (i, j)),
        compiler_params=pltpu.CompilerParams(
            dimension_semantics=("parallel", "parallel")),
    )(conv_out, scale, shift)

    return y[:M, :OC].reshape(N, OH, OW, OC)


def bn_conv2d(x, weight, gamma, beta, **kwargs):
    """NCHW wrapper matching the PyTorch module. For chained layers prefer
    bn_conv2d_nhwc and stay channels-last to avoid per-layer transposes."""
    y = bn_conv2d_nhwc(jnp.transpose(x, (0, 2, 3, 1)), weight, gamma, beta, **kwargs)
    return jnp.transpose(y, (0, 3, 1, 2))


# ----------------------- demo / check -----------------------

if __name__ == "__main__":
    key = jax.random.PRNGKey(0)

    def make_layer(k, C, OC, KH, KW):
        k_w, k_g, k_b = jax.random.split(k, 3)
        bound = 1.0 / ((C * KH * KW) ** 0.5)
        w = jax.random.uniform(k_w, (OC, C, KH, KW), jnp.float32, -bound, bound)
        g = 1.0 + 0.1 * jax.random.normal(k_g, (OC,), jnp.float32)
        b = 0.1 * jax.random.normal(k_b, (OC,), jnp.float32)
        return w, g, b

    def reference(x, w, g, b, stride, padding, dilation=1, eps=1e-5, activation=True):
        # Mirrors the kernel's mixed precision: bf16 matmul operands, f32 accumulation
        # and batch statistics, bf16 conv intermediate, f32 normalize.
        xb = x.astype(jnp.bfloat16).astype(jnp.float32)
        wb = w.astype(jnp.bfloat16).astype(jnp.float32)
        conv = lax.conv_general_dilated(
            xb, wb, window_strides=(stride, stride),
            padding=((padding, padding), (padding, padding)),
            rhs_dilation=(dilation, dilation),
            dimension_numbers=('NCHW', 'OIHW', 'NCHW'),
            precision=lax.Precision.HIGHEST)
        mu = conv.mean(axis=(0, 2, 3), keepdims=True)
        var = conv.var(axis=(0, 2, 3), keepdims=True)
        y = conv.astype(jnp.bfloat16).astype(jnp.float32)
        out = (y - mu) * lax.rsqrt(var + eps) * g.reshape(1, -1, 1, 1) + b.reshape(1, -1, 1, 1)
        return jnp.maximum(out, 0.0) if activation else out

    N, C, H, W = 2, 4, 16, 16
    k_x = jax.random.fold_in(key, 999)
    x = jax.random.normal(k_x, (N, C, H, W), jnp.float32)

    # (OC, KH, KW, stride, padding): stem-style 7x7/s2, inception 3x3/s1, 1x1 fast path.
    checks = [(8, 7, 7, 2, 3), (8, 3, 3, 1, 1), (16, 1, 1, 1, 0)]
    for idx, (OC, KH, KW, s, p) in enumerate(checks):
        w, g, b = make_layer(jax.random.fold_in(key, idx), C, OC, KH, KW)
        out = bn_conv2d(x, w, g, b, stride=s, padding=p, activation=True)
        out = jax.block_until_ready(out)
        ref = reference(x, w, g, b, s, p)
        assert out.shape == ref.shape, (out.shape, ref.shape)
        err = float(jnp.max(jnp.abs(out - ref)))
        assert err < 5e-2, (idx, err)

    print("KERNEL_OK")
</pallas_src>

<mosaic_0001>
module attributes {stable_mosaic.version = 11 : i64} {
  func.func @_conv_stats_kernel(%arg0: i32, %arg1: i32, %arg2: i32, %arg3: memref<256x256xbf16, #tpu.memory_space<vmem>>, %arg4: memref<256x128xbf16, #tpu.memory_space<vmem>>, %arg5: memref<256x128xbf16, #tpu.memory_space<vmem>>, %arg6: memref<1x128xf32, #tpu.memory_space<vmem>>, %arg7: memref<1x128xf32, #tpu.memory_space<vmem>>, %arg8: memref<256x128xf32, #tpu.memory_space<vmem>>) attributes {dimension_semantics = [#tpu.dimension_semantics<parallel>, #tpu.dimension_semantics<arbitrary>, #tpu.dimension_semantics<arbitrary>], iteration_bounds = array<i64: 1, 1, 1>, scalar_prefetch = 0 : i64, scratch_operands = 1 : i64, tpu.core_type = #tpu.core_type<tc>, window_params = [{transform_indices = @transform_0, window_bounds = array<i64: 256, 256>}, {transform_indices = @transform_1, window_bounds = array<i64: 256, 128>}, {transform_indices = @transform_2, window_bounds = array<i64: 256, 128>}, {transform_indices = @transform_3, window_bounds = array<i64: 1, 128>}, {transform_indices = @transform_4, window_bounds = array<i64: 1, 128>}]} {
    %c0_i32 = arith.constant 0 : i32
    %0 = arith.cmpi eq, %arg2, %c0_i32 : i32
    %1 = arith.extui %0 : i1 to i32
    %c0_i32_0 = arith.constant 0 : i32
    %2 = arith.cmpi ne, %1, %c0_i32_0 : i32
    scf.if %2 {
      %cst_10 = arith.constant 0.000000e+00 : f32
      %12 = vector.broadcast %cst_10 : f32 to vector<256x128xf32>
      %c0_11 = arith.constant 0 : index
      %c0_12 = arith.constant 0 : index
      %13 = vector.load %arg8[%c0_11, %c0_12] : memref<256x128xf32, #tpu.memory_space<vmem>>, vector<256x128xf32>
      tpu.vector_store %arg8[%c0_11, %c0_12], %12 {strides = array<i32>} : memref<256x128xf32, #tpu.memory_space<vmem>>, vector<256x128xf32>,
    } else {
    }
    %c0 = arith.constant 0 : index
    %c0_1 = arith.constant 0 : index
    %3 = vector.load %arg8[%c0, %c0_1] : memref<256x128xf32, #tpu.memory_space<vmem>>, vector<256x128xf32>
    %c0_2 = arith.constant 0 : index
    %c0_3 = arith.constant 0 : index
    %4 = vector.load %arg3[%c0_2, %c0_3] : memref<256x256xbf16, #tpu.memory_space<vmem>>, vector<256x256xbf16>
    %c0_4 = arith.constant 0 : index
    %c0_5 = arith.constant 0 : index
    %5 = vector.load %arg4[%c0_4, %c0_5] : memref<256x128xbf16, #tpu.memory_space<vmem>>, vector<256x128xbf16>
    %cst = arith.constant dense<0.000000e+00> : vector<256x128xf32>
    %6 = tpu.matmul %4, %5, %cst {dimension_numbers = #tpu.dot_dimension_numbers<[1], [0], [0], [1], [0, 0, 1, 1], [], []>} : vector<256x256xbf16>, vector<256x128xbf16>, vector<256x128xf32> -> vector<256x128xf32>
    %7 = arith.addf %3, %6 : vector<256x128xf32>
    %c0_6 = arith.constant 0 : index
    %c0_7 = arith.constant 0 : index
    %8 = vector.load %arg8[%c0_6, %c0_7] : memref<256x128xf32, #tpu.memory_space<vmem>>, vector<256x128xf32>
    tpu.vector_store %arg8[%c0_6, %c0_7], %7 {strides = array<i32>} : memref<256x128xf32, #tpu.memory_space<vmem>>, vector<256x128xf32>,
    %c0_i32_8 = arith.constant 0 : i32
    %9 = arith.cmpi eq, %arg2, %c0_i32_8 : i32
    %10 = arith.extui %9 : i1 to i32
    %c0_i32_9 = arith.constant 0 : i32
    %11 = arith.cmpi ne, %10, %c0_i32_9 : i32
    scf.if %11 {
      %c0_10 = arith.constant 0 : index
      %c0_11 = arith.constant 0 : index
      %12 = vector.load %arg8[%c0_10, %c0_11] : memref<256x128xf32, #tpu.memory_space<vmem>>, vector<256x128xf32>
      %13 = arith.truncf %12 : vector<256x128xf32> to vector<256x128xbf16>
      %c0_12 = arith.constant 0 : index
      %c0_13 = arith.constant 0 : index
      %14 = vector.load %arg5[%c0_12, %c0_13] : memref<256x128xbf16, #tpu.memory_space<vmem>>, vector<256x128xbf16>
      tpu.vector_store %arg5[%c0_12, %c0_13], %13 {strides = array<i32>} : memref<256x128xbf16, #tpu.memory_space<vmem>>, vector<256x128xbf16>,
      %cst_14 = arith.constant dense<0.000000e+00> : vector<128xf32>
      %15 = vector.multi_reduction <add>, %12, %cst_14 [0] : vector<256x128xf32> to vector<128xf32>
      %16 = vector.shape_cast %15 : vector<128xf32> to vector<1x128xf32>
      %17 = arith.mulf %12, %12 : vector<256x128xf32>
      %cst_15 = arith.constant dense<0.000000e+00> : vector<128xf32>
      %18 = vector.multi_reduction <add>, %17, %cst_15 [0] : vector<256x128xf32> to vector<128xf32>
      %19 = vector.shape_cast %18 : vector<128xf32> to vector<1x128xf32>
      %c0_i32_16 = arith.constant 0 : i32
      %20 = arith.cmpi eq, %arg1, %c0_i32_16 : i32
      %21 = arith.extui %20 : i1 to i32
      %c0_i32_17 = arith.constant 0 : i32
      %22 = arith.cmpi ne, %21, %c0_i32_17 : i32
      scf.if %22 {
        %c0_20 = arith.constant 0 : index
        %c0_21 = arith.constant 0 : index
        %26 = vector.load %arg6[%c0_20, %c0_21] : memref<1x128xf32, #tpu.memory_space<vmem>>, vector<1x128xf32>
        tpu.vector_store %arg6[%c0_20, %c0_21], %16 {strides = array<i32>} : memref<1x128xf32, #tpu.memory_space<vmem>>, vector<1x128xf32>,
        %c0_22 = arith.constant 0 : index
        %c0_23 = arith.constant 0 : index
        %27 = vector.load %arg7[%c0_22, %c0_23] : memref<1x128xf32, #tpu.memory_space<vmem>>, vector<1x128xf32>
        tpu.vector_store %arg7[%c0_22, %c0_23], %19 {strides = array<i32>} : memref<1x128xf32, #tpu.memory_space<vmem>>, vector<1x128xf32>,
      } else {
      }
      %c0_i32_18 = arith.constant 0 : i32
      %23 = arith.cmpi sgt, %arg1, %c0_i32_18 : i32
      %24 = arith.extui %23 : i1 to i32
      %c0_i32_19 = arith.constant 0 : i32
      %25 = arith.cmpi ne, %24, %c0_i32_19 : i32
      scf.if %25 {
        %c0_20 = arith.constant 0 : index
        %c0_21 = arith.constant 0 : index
        %26 = vector.load %arg6[%c0_20, %c0_21] : memref<1x128xf32, #tpu.memory_space<vmem>>, vector<1x128xf32>
        %27 = arith.addf %26, %16 : vector<1x128xf32>
        %c0_22 = arith.constant 0 : index
        %c0_23 = arith.constant 0 : index
        %28 = vector.load %arg6[%c0_22, %c0_23] : memref<1x128xf32, #tpu.memory_space<vmem>>, vector<1x128xf32>
        tpu.vector_store %arg6[%c0_22, %c0_23], %27 {strides = array<i32>} : memref<1x128xf32, #tpu.memory_space<vmem>>, vector<1x128xf32>,
        %c0_24 = arith.constant 0 : index
        %c0_25 = arith.constant 0 : index
        %29 = vector.load %arg7[%c0_24, %c0_25] : memref<1x128xf32, #tpu.memory_space<vmem>>, vector<1x128xf32>
        %30 = arith.addf %29, %19 : vector<1x128xf32>
        %c0_26 = arith.constant 0 : index
        %c0_27 = arith.constant 0 : index
        %31 = vector.load %arg7[%c0_26, %c0_27] : memref<1x128xf32, #tpu.memory_space<vmem>>, vector<1x128xf32>
        tpu.vector_store %arg7[%c0_26, %c0_27], %30 {strides = array<i32>} : memref<1x128xf32, #tpu.memory_space<vmem>>, vector<1x128xf32>,
      } else {
      }
    } else {
    }
    return
  }
  func.func @transform_0(%arg0: i32, %arg1: i32, %arg2: i32) -> (i32, i32) {
    %c0_i32 = arith.constant 0 : i32
    return %arg1, %arg2 : i32, i32
  }
  func.func @transform_1(%arg0: i32, %arg1: i32, %arg2: i32) -> (i32, i32) {
    %c0_i32 = arith.constant 0 : i32
    return %arg2, %arg0 : i32, i32
  }
  func.func @transform_2(%arg0: i32, %arg1: i32, %arg2: i32) -> (i32, i32) {
    %c0_i32 = arith.constant 0 : i32
    return %arg1, %arg0 : i32, i32
  }
  func.func @transform_3(%arg0: i32, %arg1: i32, %arg2: i32) -> (i32, i32) {
    %c0_i32 = arith.constant 0 : i32
    %c0_i32_0 = arith.constant 0 : i32
    return %c0_i32, %arg0 : i32, i32
  }
  func.func @transform_4(%arg0: i32, %arg1: i32, %arg2: i32) -> (i32, i32) {
    %c0_i32 = arith.constant 0 : i32
    %c0_i32_0 = arith.constant 0 : i32
    return %c0_i32, %arg0 : i32, i32
  }
}

</mosaic_0001>

<bundles_post_ra>
// kernel: tpu_custom_call.1
= control target key start
LH: loop header
LB: loop body
LE: loop exit
PB: predicated region body
PF: predicated region fallthrough
CT: control target
= control target key end

     0   :  { %10 = vsyncpa [#allocation4], 0  ;;  %s1750_s0 = inlined_call_operand.hbm [shape: bf16[256,256], index: 0, kind: input, shape index: {}]   ;;  %s1751_s1 = inlined_call_operand.hbm [shape: bf16[256,128], index: 1, kind: input, shape index: {}]   ;;  %s1752_s2 = inlined_call_operand.hbm [shape: bf16[256,128], index: 2, kind: output, shape index: {0}]   ;;  %s1753_s3 = inlined_call_operand.hbm [shape: f32[1,128], index: 3, kind: output, shape index: {1}]   ;;  %s1754_s4 = inlined_call_operand.hbm [shape: f32[1,128], index: 4, kind: output, shape index: {2}]  }
   0x1   :  { %11 = vsyncpa [#allocation7], 0 }
   0x2   :  { %12 = vsyncpa [#allocation5], 0 }
   0x3   :  { %13 = vsyncpa [#allocation10], 0  ;;  %s1546_s15 = smov [#allocation3]   ;;  %s1428_s19 = scalar_lea.hbm %s1750_s0, 4096 }
   0x4   :  { %s19_s16 = sshll.u32 %s1546_s15, 4  ;;  %p1429_p0 = scmp.ne.s32.totalorder %s1750_s0, %s1428_s19  ;;  %s20_s16 = int_to_ptr.vmem [resolvable:$true] %s19_s16 }
   0x5   :  { %p1432_p1 = scmp.lt.u32.totalorder %s1428_s19, %s1750_s0 }
   0x7   :  { %p1434_p2 = pnand %p1432_p1, %p1429_p0 }
   0x9   :  { %1437 = shalt.err (!%p1434_p2)
}
   0xa   :  { %s1438_s24 = scalar_lea.vmem %s20_s16, 4096  ;;  %p1443_p4 = scmp.lt.s32.totalorder %s20_s16, %s20_s16 }
   0xb   :  { %p1439_p3 = scmp.ne.s32.totalorder %s20_s16, %s1438_s24  ;;  %p1444_p5 = scmp.lt.s32.totalorder %s1438_s24, %s1438_s24 }
   0xd   :  { %p1445_p6 = por %p1444_p5, %p1443_p4 }
   0xf   :  { %p1446_p7 = pnand %p1445_p6, %p1439_p3 }
  0x11   :  { %1449 = shalt.err (!%p1446_p7)
}
  0x12   :  { %s1547_s25 = smov 128   ;;  %s1548_s26 = smov 8  }
  0x13   :  { %25 = dma.hbm_to_vmem [thread:$0]  %s1750_s0, 4096, %s20_s16, [#allocation4], %s1547_s25, %s1547_s25, %s1548_s26  }
  0x14   :  { %s1549_s29 = smov [#allocation6]   ;;  %s1450_s7 = scalar_lea.hbm %s1751_s1, 2048 }
  0x15   :  { %s31_s30 = sshll.u32 %s1549_s29, 4  ;;  %p1451_p8 = scmp.ne.s32.totalorder %s1751_s1, %s1450_s7  ;;  %s32_s30 = int_to_ptr.vmem [resolvable:$true] %s31_s30 }
  0x16   :  { %p1454_p9 = scmp.lt.u32.totalorder %s1450_s7, %s1751_s1 }
  0x18   :  { %p1456_p10 = pnand %p1454_p9, %p1451_p8 }
  0x1a   :  { %1459 = shalt.err (!%p1456_p10)
}
  0x1b   :  { %s1460_s12 = scalar_lea.vmem %s32_s30, 2048  ;;  %p1465_p12 = scmp.lt.s32.totalorder %s32_s30, %s32_s30 }
  0x1c   :  { %p1461_p11 = scmp.ne.s32.totalorder %s32_s30, %s1460_s12  ;;  %p1466_p13 = scmp.lt.s32.totalorder %s1460_s12, %s1460_s12 }
  0x1e   :  { %p1467_p0 = por %p1466_p13, %p1465_p12 }
  0x20   :  { %p1468_p1 = pnand %p1467_p0, %p1461_p11 }
  0x22   :  { %1471 = shalt.err (!%p1468_p1)
}
  0x23   :  { %s1550_s0 = smov 64   ;;  %s1551_s13 = smov 4  }
  0x24   :  { %37 = dma.hbm_to_vmem [thread:$0]  %s1751_s1, 2048, %s32_s30, [#allocation7], %s1550_s0, %s1550_s0, %s1551_s13  }
  0x25   :  { %1538 = dma.done.wait [#allocation4], 4096  }
  0x26   :  { %1539 = vsyncadd [#allocation4], 4294963200 }
  0x27   :  { %1540 = dma.done.wait [#allocation7], 2048  }
  0x28   :  { %1541 = vsyncadd [#allocation7], 4294965248  ;;  %v1364_v0 = vld [vmem:[#allocation6 + $0x40] sm:$0xff]   ;;  %v1366_v2 = vld [vmem:[#allocation6 + $0x48] sm:$0xff]   ;;  %s1552_s1 = smov [#allocation8]  }
  0x29   :  { %v1365_v1 = vld [vmem:[#allocation6] sm:$0xff]   ;;  %1227 = vmatprep.subr.bf16.mxu0 %v1364_v0  ;;  %1339 = vmatprep.subr.bf16.mxu1 %v1364_v0  ;;  %v1367_v3 = vld [vmem:[#allocation6 + $0x8] sm:$0xff]   ;;  %v1368_v4 = vld [vmem:[#allocation6 + $0x50] sm:$0xff]   ;;  %s980_s16 = sshll.u32 %s1552_s1, 4  ;;  %s981_s16 = int_to_ptr.vmem [resolvable:$true] %s980_s16 }
  0x2a   :  { %1228 = vmatpush3.bf16.msra.mxu0 %v1365_v1  ;;  %1347 = vmatpush3.bf16.msra.mxu1 %v1365_v1  ;;  %v1369_v5 = vld [vmem:[#allocation6 + $0x10] sm:$0xff]   ;;  %v1370_v6 = vld [vmem:[#allocation6 + $0x58] sm:$0xff]   ;;  %v1372_v8 = vld [vmem:[#allocation6 + $0x60] sm:$0xff]   ;;  %s1472_s17 = scalar_lea.vmem %s981_s16, 2048  ;;  %p1477_p3 = scmp.lt.s32.totalorder %s981_s16, %s981_s16 }
  0x2b   :  { %1229 = vmatprep.subr.bf16.mxu0 %v1366_v2  ;;  %1340 = vmatprep.subr.bf16.mxu1 %v1366_v2  ;;  %v1371_v7 = vld [vmem:[#allocation6 + $0x18] sm:$0xff]   ;;  %v1373_v9 = vld [vmem:[#allocation6 + $0x20] sm:$0xff]   ;;  %v1374_v10 = vld [vmem:[#allocation6 + $0x68] sm:$0xff]   ;;  %p1473_p2 = scmp.ne.s32.totalorder %s981_s16, %s1472_s17  ;;  %p1478_p4 = scmp.lt.s32.totalorder %s1472_s17, %s1472_s17 }
  0x2c   :  { %v1382_v11 = vld [vmem:[#allocation3 + $0x4] ss:$8 sps:$4 sm:$0xff]   ;;  %v1376_v13 = vld [vmem:[#allocation6 + $0x70] sm:$0xff]   ;;  %v1378_v16 = vld [vmem:[#allocation6 + $0x78] sm:$0xff]  }
  0x2d   :  { %v1375_v12 = vld [vmem:[#allocation6 + $0x28] sm:$0xff]   ;;  %465 = vmatprep.mubr.bf16.mxu0 %v1382_v11  ;;  %v1377_v15 = vld [vmem:[#allocation6 + $0x30] sm:$0xff]   ;;  %v1379_v17 = vld [vmem:[#allocation6 + $0x38] sm:$0xff]   ;;  %p1479_p5 = por %p1478_p4, %p1477_p3 }
  0x2e   :  { %1230 = vmatpush3.bf16.msra.mxu0 %v1367_v3  ;;  %1348 = vmatpush3.bf16.msra.mxu1 %v1367_v3  ;;  %v1394_v14 = vld [vmem:[#allocation3 + $0x84] ss:$8 sps:$4 sm:$0xff]   ;;  %v1380_v18 = vld [vmem:[#allocation3] ss:$8 sps:$4 sm:$0xff]   ;;  %v1383_v19 = vld [vmem:[#allocation3 + $0x14] ss:$8 sps:$4 sm:$0xff]  }
  0x2f   :  { %1231 = vmatprep.subr.bf16.mxu0 %v1368_v4  ;;  %1341 = vmatprep.subr.bf16.mxu1 %v1368_v4  ;;  %v1392_v20 = vld [vmem:[#allocation3 + $0x80] ss:$8 sps:$4 sm:$0xff]   ;;  %v1398_v21 = vld [vmem:[#allocation3 + $0x94] ss:$8 sps:$4 sm:$0xff]   ;;  %v1385_v22 = vld [vmem:[#allocation3 + $0x10] ss:$8 sps:$4 sm:$0xff]   ;;  %p1480_p6 = pnand %p1479_p5, %p1473_p2 }
  0x30   :  { %529 = vmatprep.mubr.bf16.mxu1 %v1394_v14  ;;  %v1386_v23 = vld [vmem:[#allocation3 + $0x24] ss:$8 sps:$4 sm:$0xff]   ;;  %v1400_v24 = vld [vmem:[#allocation3 + $0x90] ss:$8 sps:$4 sm:$0xff]   ;;  %v1388_v26 = vld [vmem:[#allocation3 + $0x20] ss:$8 sps:$4 sm:$0xff]  }
  0x31   :  { %v1404_v25 = vld [vmem:[#allocation3 + $0xa4] ss:$8 sps:$4 sm:$0xff]   ;;  %v1389_v27 = vld [vmem:[#allocation3 + $0x34] ss:$8 sps:$4 sm:$0xff]   ;;  %v1406_v28 = vld [vmem:[#allocation3 + $0xa0] ss:$8 sps:$4 sm:$0xff]  }
  0x32   :  { %1232 = vmatpush3.bf16.msra.mxu0 %v1369_v5  ;;  %1349 = vmatpush3.bf16.msra.mxu1 %v1369_v5  ;;  %v1410_v29 = vld [vmem:[#allocation3 + $0xb4] ss:$8 sps:$4 sm:$0xff]   ;;  %v1391_v30 = vld [vmem:[#allocation3 + $0x30] ss:$8 sps:$4 sm:$0xff]   ;;  %v1395_v31 = vld [vmem:[#allocation3 + $0x44] ss:$8 sps:$4 sm:$0xff]  }
  0x33   :  { %1233 = vmatprep.subr.bf16.mxu0 %v1370_v6  ;;  %1342 = vmatprep.subr.bf16.mxu1 %v1370_v6  ;;  %v1412_v32 = vld [vmem:[#allocation3 + $0xb0] ss:$8 sps:$4 sm:$0xff]   ;;  %v1416_v33 = vld [vmem:[#allocation3 + $0xc4] ss:$8 sps:$4 sm:$0xff]   ;;  %v1397_v34 = vld [vmem:[#allocation3 + $0x40] ss:$8 sps:$4 sm:$0xff]  }
  0x34   :  { %v1401_v35 = vld [vmem:[#allocation3 + $0x54] ss:$8 sps:$4 sm:$0xff]   ;;  %v1418_v36 = vld [vmem:[#allocation3 + $0xc0] ss:$8 sps:$4 sm:$0xff]   ;;  %v1403_v38 = vld [vmem:[#allocation3 + $0x50] ss:$8 sps:$4 sm:$0xff]  }
  0x35   :  { %v1419_v37 = vld [vmem:[#allocation3 + $0xd4] ss:$8 sps:$4 sm:$0xff]   ;;  %v1407_v39 = vld [vmem:[#allocation3 + $0x64] ss:$8 sps:$4 sm:$0xff]   ;;  %v1421_v40 = vld [vmem:[#allocation3 + $0xd0] ss:$8 sps:$4 sm:$0xff]  }
  0x36   :  { %1234 = vmatpush3.bf16.msra.mxu0 %v1371_v7  ;;  %1350 = vmatpush3.bf16.msra.mxu1 %v1371_v7  ;;  %v1422_v41 = vld [vmem:[#allocation3 + $0xe4] ss:$8 sps:$4 sm:$0xff]   ;;  %v1409_v42 = vld [vmem:[#allocation3 + $0x60] ss:$8 sps:$4 sm:$0xff]   ;;  %v1413_v43 = vld [vmem:[#allocation3 + $0x74] ss:$8 sps:$4 sm:$0xff]  }
  0x37   :  { %1235 = vmatprep.subr.bf16.mxu0 %v1372_v8  ;;  %1343 = vmatprep.subr.bf16.mxu1 %v1372_v8  ;;  %v1424_v44 = vld [vmem:[#allocation3 + $0xe0] ss:$8 sps:$4 sm:$0xff]   ;;  %v1425_v45 = vld [vmem:[#allocation3 + $0xf4] ss:$8 sps:$4 sm:$0xff]   ;;  %v1415_v46 = vld [vmem:[#allocation3 + $0x70] ss:$8 sps:$4 sm:$0xff]  }
  0x38   :  { %v1427_v47 = vld [vmem:[#allocation3 + $0xf0] ss:$8 sps:$4 sm:$0xff]  }
  0x3a   :  { %1236 = vmatpush3.bf16.msra.mxu0 %v1373_v9  ;;  %1351 = vmatpush3.bf16.msra.mxu1 %v1373_v9 }
  0x3b   :  { %1237 = vmatprep.subr.bf16.mxu0 %v1374_v10  ;;  %1344 = vmatprep.subr.bf16.mxu1 %v1374_v10 }
  0x3e   :  { %1238 = vmatpush3.bf16.msra.mxu0 %v1375_v12  ;;  %1352 = vmatpush3.bf16.msra.mxu1 %v1375_v12 }
  0x3f   :  { %1239 = vmatprep.subr.bf16.mxu0 %v1376_v13  ;;  %1345 = vmatprep.subr.bf16.mxu1 %v1376_v13 }
  0x42   :  { %1240 = vmatpush3.bf16.msra.mxu0 %v1377_v15  ;;  %1353 = vmatpush3.bf16.msra.mxu1 %v1377_v15 }
  0x43   :  { %1241 = vmatprep.subr.bf16.mxu0 %v1378_v16  ;;  %1346 = vmatprep.subr.bf16.mxu1 %v1378_v16 }
  0x46   :  { %1242 = vmatpush3.bf16.msra.mxu0 %v1379_v17  ;;  %1354 = vmatpush3.bf16.msra.mxu1 %v1379_v17 }
  0x49   :  { %466 = vmatmul.mubr.bf16.vlgmr.msra.gmra.mrb[0].mxu0 %v1380_v18  ;;  %530 = vmatmul.mubr.bf16.vlgmr.msra.gmra.mrb[0].mxu1 %v1392_v20 }
  0x4a   :  { %473 = vmatprep.mubr.bf16.mxu0 %v1383_v19  ;;  %537 = vmatprep.mubr.bf16.mxu1 %v1398_v21 }
  0x51   :  { %474 = vmatmul.mubr.bf16.gmra.mrb[4].mxu0 %v1385_v22  ;;  %538 = vmatmul.mubr.bf16.gmra.mrb[4].mxu1 %v1400_v24 }
  0x52   :  { %481 = vmatprep.mubr.bf16.mxu0 %v1386_v23  ;;  %545 = vmatprep.mubr.bf16.mxu1 %v1404_v25 }
  0x59   :  { %482 = vmatmul.mubr.bf16.gmra.mrb[8].mxu0 %v1388_v26  ;;  %546 = vmatmul.mubr.bf16.gmra.mrb[8].mxu1 %v1406_v28 }
  0x5a   :  { %489 = vmatprep.mubr.bf16.mxu0 %v1389_v27  ;;  %553 = vmatprep.mubr.bf16.mxu1 %v1410_v29 }
  0x61   :  { %490 = vmatmul.mubr.bf16.gmra.mrb[12].mxu0 %v1391_v30  ;;  %554 = vmatmul.mubr.bf16.gmra.mrb[12].mxu1 %v1412_v32 }
  0x62   :  { %497 = vmatprep.mubr.bf16.mxu0 %v1395_v31  ;;  %561 = vmatprep.mubr.bf16.mxu1 %v1416_v33 }
  0x69   :  { %498 = vmatmul.mubr.bf16.gmra.mrb[16].mxu0 %v1397_v34  ;;  %562 = vmatmul.mubr.bf16.gmra.mrb[16].mxu1 %v1418_v36 }
  0x6a   :  { %505 = vmatprep.mubr.bf16.mxu0 %v1401_v35  ;;  %569 = vmatprep.mubr.bf16.mxu1 %v1419_v37 }
  0x71   :  { %506 = vmatmul.mubr.bf16.gmra.mrb[20].mxu0 %v1403_v38  ;;  %570 = vmatmul.mubr.bf16.gmra.mrb[20].mxu1 %v1421_v40 }
  0x72   :  { %513 = vmatprep.mubr.bf16.mxu0 %v1407_v39  ;;  %577 = vmatprep.mubr.bf16.mxu1 %v1422_v41 }
  0x79   :  { %514 = vmatmul.mubr.bf16.gmra.mrb[24].mxu0 %v1409_v42  ;;  %578 = vmatmul.mubr.bf16.gmra.mrb[24].mxu1 %v1424_v44 }
  0x7a   :  { %521 = vmatprep.mubr.bf16.mxu0 %v1413_v43  ;;  %585 = vmatprep.mubr.bf16.mxu1 %v1425_v45 }
  0x81   :  { %522 = vmatmul.mubr.bf16.gmra.mrb[28].mxu0 %v1415_v46  ;;  %586 = vmatmul.mubr.bf16.gmra.mrb[28].mxu1 %v1427_v47 }
 0x11c   :  { %v1243_v48 = vpop.f32.mrb[0].mxu0  ;;  %v1291_v50 = vpop.f32.mrb[0].mxu1 }
 0x11d   :  { %v1244_v49 = vpop.f32.mrb[1].mxu0  ;;  %v1292_v53 = vpop.f32.mrb[1].mxu1 }
 0x11e   :  { %v1245_v51 = vadd.f32 %v1244_v49, %v1243_v48  ;;  %v1246_v52 = vpop.f32.mrb[2].mxu0  ;;  %v1607_v55 = vadd.f32 %v1292_v53, %v1291_v50  ;;  %v1294_v56 = vpop.f32.mrb[2].mxu1 }
 0x11f   :  { %v1247_v54 = vpop.f32.mrb[3].mxu0  ;;  %v1295_v58 = vpop.f32.mrb[3].mxu1 }
 0x120   :  { %v1248_v57 = vadd.f32 %v1247_v54, %v1246_v52  ;;  %v1609_v59 = vadd.f32 %v1295_v58, %v1294_v56  ;;  %v890_v60 = vmul.f32 %v1245_v51, %v1245_v51 }
 0x122   :  { %v1135_v61 = vpack.c.bf16 %v1248_v57, %v1245_v51  ;;  %v853_v62 = vadd.f32 %v1248_v57, %v1245_v51  ;;  %v891_v63 = vmul.f32 %v1248_v57, %v1248_v57  ;;  %v1175_v0 = vpack.c.bf16 %v1609_v59, %v1607_v55 }
 0x124   :  { %1136 = vst [vmem:[#allocation8] sm:$0xff] %v1135_v61   ;;  %v922_v1 = vadd.f32 %v891_v63, %v890_v60  ;;  %v1249_v2 = vpop.f32.mrb[4].mxu0  ;;  %1219 = vst [vmem:[#allocation8 + $0x40] sm:$0xff] %v1175_v0   ;;  %v1297_v4 = vpop.f32.mrb[4].mxu1 }
 0x125   :  { %v1250_v3 = vpop.f32.mrb[5].mxu0  ;;  %v1298_v7 = vpop.f32.mrb[5].mxu1 }
 0x126   :  { %v1251_v5 = vadd.f32 %v1250_v3, %v1249_v2  ;;  %v1252_v6 = vpop.f32.mrb[6].mxu0  ;;  %v1613_v9 = vadd.f32 %v1298_v7, %v1297_v4  ;;  %v1300_v10 = vpop.f32.mrb[6].mxu1 }
 0x127   :  { %v1253_v8 = vpop.f32.mrb[7].mxu0  ;;  %v1301_v14 = vpop.f32.mrb[7].mxu1 }
 0x128   :  { %v854_v11 = vadd.f32 %v1251_v5, %v853_v62  ;;  %v892_v12 = vmul.f32 %v1251_v5, %v1251_v5  ;;  %v1254_v13 = vadd.f32 %v1253_v8, %v1252_v6  ;;  %v1615_v15 = vadd.f32 %v1301_v14, %v1300_v10 }
 0x12a   :  { %v923_v16 = vadd.f32 %v922_v1, %v892_v12  ;;  %v1140_v17 = vpack.c.bf16 %v1254_v13, %v1251_v5  ;;  %v855_v18 = vadd.f32 %v1254_v13, %v854_v11  ;;  %v893_v19 = vmul.f32 %v1254_v13, %v1254_v13 }
 0x12b   :  { %v1180_v20 = vpack.c.bf16 %v1615_v15, %v1613_v9 }
 0x12c   :  { %1212 = vst [vmem:[#allocation8 + $0x8] sm:$0xff] %v1140_v17   ;;  %v924_v21 = vadd.f32 %v923_v16, %v893_v19  ;;  %v1255_v22 = vpop.f32.mrb[8].mxu0  ;;  %v1303_v24 = vpop.f32.mrb[8].mxu1 }
 0x12d   :  { %v1256_v23 = vpop.f32.mrb[9].mxu0  ;;  %1220 = vst [vmem:[#allocation8 + $0x48] sm:$0xff] %v1180_v20   ;;  %v1304_v27 = vpop.f32.mrb[9].mxu1 }
 0x12e   :  { %v1257_v25 = vadd.f32 %v1256_v23, %v1255_v22  ;;  %v1258_v26 = vpop.f32.mrb[10].mxu0  ;;  %v1619_v29 = vadd.f32 %v1304_v27, %v1303_v24  ;;  %v1306_v30 = vpop.f32.mrb[10].mxu1 }
 0x12f   :  { %v1259_v28 = vpop.f32.mrb[11].mxu0  ;;  %v1307_v34 = vpop.f32.mrb[11].mxu1 }
 0x130   :  { %v856_v31 = vadd.f32 %v1257_v25, %v855_v18  ;;  %v894_v32 = vmul.f32 %v1257_v25, %v1257_v25  ;;  %v1260_v33 = vadd.f32 %v1259_v28, %v1258_v26  ;;  %v1621_v35 = vadd.f32 %v1307_v34, %v1306_v30 }
 0x132   :  { %v925_v36 = vadd.f32 %v924_v21, %v894_v32  ;;  %v1145_v37 = vpack.c.bf16 %v1260_v33, %v1257_v25  ;;  %v857_v38 = vadd.f32 %v1260_v33, %v856_v31  ;;  %v895_v39 = vmul.f32 %v1260_v33, %v1260_v33 }
 0x133   :  { %v1185_v40 = vpack.c.bf16 %v1621_v35, %v1619_v29 }
 0x134   :  { %1213 = vst [vmem:[#allocation8 + $0x10] sm:$0xff] %v1145_v37   ;;  %v926_v41 = vadd.f32 %v925_v36, %v895_v39  ;;  %v1261_v42 = vpop.f32.mrb[12].mxu0  ;;  %v1309_v44 = vpop.f32.mrb[12].mxu1 }
 0x135   :  { %v1262_v43 = vpop.f32.mrb[13].mxu0  ;;  %1221 = vst [vmem:[#allocation8 + $0x50] sm:$0xff] %v1185_v40   ;;  %v1310_v47 = vpop.f32.mrb[13].mxu1 }
 0x136   :  { %v1263_v45 = vadd.f32 %v1262_v43, %v1261_v42  ;;  %v1264_v46 = vpop.f32.mrb[14].mxu0  ;;  %v1625_v49 = vadd.f32 %v1310_v47, %v1309_v44  ;;  %v1312_v50 = vpop.f32.mrb[14].mxu1 }
 0x137   :  { %v1265_v48 = vpop.f32.mrb[15].mxu0  ;;  %v1313_v54 = vpop.f32.mrb[15].mxu1 }
 0x138   :  { %v858_v51 = vadd.f32 %v1263_v45, %v857_v38  ;;  %v896_v52 = vmul.f32 %v1263_v45, %v1263_v45  ;;  %v1266_v53 = vadd.f32 %v1265_v48, %v1264_v46  ;;  %v1627_v56 = vadd.f32 %v1313_v54, %v1312_v50 }
 0x13a   :  { %v927_v57 = vadd.f32 %v926_v41, %v896_v52  ;;  %v1150_v58 = vpack.c.bf16 %v1266_v53, %v1263_v45  ;;  %v859_v60 = vadd.f32 %v1266_v53, %v858_v51  ;;  %v897_v61 = vmul.f32 %v1266_v53, %v1266_v53 }
 0x13b   :  { %v1190_v62 = vpack.c.bf16 %v1627_v56, %v1625_v49 }
 0x13c   :  { %1214 = vst [vmem:[#allocation8 + $0x18] sm:$0xff] %v1150_v58   ;;  %v928_v63 = vadd.f32 %v927_v57, %v897_v61  ;;  %v1267_v0 = vpop.f32.mrb[16].mxu0  ;;  %v1315_v2 = vpop.f32.mrb[16].mxu1 }
 0x13d   :  { %v1268_v1 = vpop.f32.mrb[17].mxu0  ;;  %1222 = vst [vmem:[#allocation8 + $0x58] sm:$0xff] %v1190_v62   ;;  %v1316_v5 = vpop.f32.mrb[17].mxu1 }
 0x13e   :  { %v1269_v3 = vadd.f32 %v1268_v1, %v1267_v0  ;;  %v1270_v4 = vpop.f32.mrb[18].mxu0  ;;  %v1631_v7 = vadd.f32 %v1316_v5, %v1315_v2  ;;  %v1318_v8 = vpop.f32.mrb[18].mxu1 }
 0x13f   :  { %v1271_v6 = vpop.f32.mrb[19].mxu0  ;;  %v1319_v13 = vpop.f32.mrb[19].mxu1 }
 0x140   :  { %v860_v10 = vadd.f32 %v1269_v3, %v859_v60  ;;  %v898_v11 = vmul.f32 %v1269_v3, %v1269_v3  ;;  %v1272_v12 = vadd.f32 %v1271_v6, %v1270_v4  ;;  %v1633_v14 = vadd.f32 %v1319_v13, %v1318_v8 }
 0x142   :  { %v929_v16 = vadd.f32 %v928_v63, %v898_v11  ;;  %v1155_v17 = vpack.c.bf16 %v1272_v12, %v1269_v3  ;;  %v861_v18 = vadd.f32 %v1272_v12, %v860_v10  ;;  %v899_v19 = vmul.f32 %v1272_v12, %v1272_v12 }
 0x143   :  { %v1195_v20 = vpack.c.bf16 %v1633_v14, %v1631_v7 }
 0x144   :  { %1215 = vst [vmem:[#allocation8 + $0x20] sm:$0xff] %v1155_v17   ;;  %v930_v21 = vadd.f32 %v929_v16, %v899_v19  ;;  %v1273_v22 = vpop.f32.mrb[20].mxu0  ;;  %v1321_v24 = vpop.f32.mrb[20].mxu1 }
 0x145   :  { %v1274_v23 = vpop.f32.mrb[21].mxu0  ;;  %1223 = vst [vmem:[#allocation8 + $0x60] sm:$0xff] %v1195_v20   ;;  %v1322_v27 = vpop.f32.mrb[21].mxu1 }
 0x146   :  { %v1275_v25 = vadd.f32 %v1274_v23, %v1273_v22  ;;  %v1276_v26 = vpop.f32.mrb[22].mxu0  ;;  %v1637_v30 = vadd.f32 %v1322_v27, %v1321_v24  ;;  %v1324_v31 = vpop.f32.mrb[22].mxu1  ;;  %v906_v27 = vmul.f32 %v1607_v55, %v1607_v55 }
 0x147   :  { %v1277_v28 = vpop.f32.mrb[23].mxu0  ;;  %v1325_v36 = vpop.f32.mrb[23].mxu1 }
 0x148   :  { %v862_v32 = vadd.f32 %v1275_v25, %v861_v18  ;;  %v900_v33 = vmul.f32 %v1275_v25, %v1275_v25  ;;  %v1278_v34 = vadd.f32 %v1277_v28, %v1276_v26  ;;  %v1639_v37 = vadd.f32 %v1325_v36, %v1324_v31 }
 0x14a   :  { %v931_v38 = vadd.f32 %v930_v21, %v900_v33  ;;  %v1160_v39 = vpack.c.bf16 %v1278_v34, %v1275_v25  ;;  %v863_v40 = vadd.f32 %v1278_v34, %v862_v32  ;;  %v901_v41 = vmul.f32 %v1278_v34, %v1278_v34 }
 0x14b   :  { %v1200_v42 = vpack.c.bf16 %v1639_v37, %v1637_v30  ;;  %v907_v32 = vmul.f32 %v1609_v59, %v1609_v59 }
 0x14c   :  { %1216 = vst [vmem:[#allocation8 + $0x28] sm:$0xff] %v1160_v39   ;;  %v932_v43 = vadd.f32 %v931_v38, %v901_v41  ;;  %v1279_v44 = vpop.f32.mrb[24].mxu0  ;;  %v1327_v46 = vpop.f32.mrb[24].mxu1 }
 0x14d   :  { %v1280_v45 = vpop.f32.mrb[25].mxu0  ;;  %1224 = vst [vmem:[#allocation8 + $0x68] sm:$0xff] %v1200_v42   ;;  %v1328_v50 = vpop.f32.mrb[25].mxu1 }
 0x14e   :  { %v1281_v47 = vadd.f32 %v1280_v45, %v1279_v44  ;;  %v1282_v48 = vpop.f32.mrb[26].mxu0  ;;  %v1643_v52 = vadd.f32 %v1328_v50, %v1327_v46  ;;  %v1330_v53 = vpop.f32.mrb[26].mxu1 }
 0x14f   :  { %v1283_v51 = vpop.f32.mrb[27].mxu0  ;;  %v1331_v60 = vpop.f32.mrb[27].mxu1 }
 0x150   :  { %v864_v54 = vadd.f32 %v1281_v47, %v863_v40  ;;  %v902_v57 = vmul.f32 %v1281_v47, %v1281_v47  ;;  %v1284_v58 = vadd.f32 %v1283_v51, %v1282_v48  ;;  %v1645_v61 = vadd.f32 %v1331_v60, %v1330_v53 }
 0x152   :  { %v933_v62 = vadd.f32 %v932_v43, %v902_v57  ;;  %v1165_v63 = vpack.c.bf16 %v1284_v58, %v1281_v47  ;;  %v865_v0 = vadd.f32 %v1284_v58, %v864_v54  ;;  %v903_v1 = vmul.f32 %v1284_v58, %v1284_v58 }
 0x153   :  { %v1205_v2 = vpack.c.bf16 %v1645_v61, %v1643_v52 }
 0x154   :  { %1217 = vst [vmem:[#allocation8 + $0x30] sm:$0xff] %v1165_v63   ;;  %v934_v3 = vadd.f32 %v933_v62, %v903_v1  ;;  %v1285_v4 = vpop.f32.mrb[28].mxu0  ;;  %v1333_v6 = vpop.f32.mrb[28].mxu1 }
 0x155   :  { %v1286_v5 = vpop.f32.mrb[29].mxu0  ;;  %1225 = vst [vmem:[#allocation8 + $0x70] sm:$0xff] %v1205_v2   ;;  %v1334_v11 = vpop.f32.mrb[29].mxu1 }
 0x156   :  { %v1287_v8 = vadd.f32 %v1286_v5, %v1285_v4  ;;  %v1288_v10 = vpop.f32.mrb[30].mxu0  ;;  %v1649_v13 = vadd.f32 %v1334_v11, %v1333_v6  ;;  %v1336_v16 = vpop.f32.mrb[30].mxu1 }
 0x157   :  { %v1289_v12 = vpop.f32.mrb[31].mxu0  ;;  %v1337_v20 = vpop.f32.mrb[31].mxu1 }
 0x158   :  { %v866_v17 = vadd.f32 %v1287_v8, %v865_v0  ;;  %v904_v18 = vmul.f32 %v1287_v8, %v1287_v8  ;;  %v1290_v19 = vadd.f32 %v1289_v12, %v1288_v10  ;;  %v1651_v21 = vadd.f32 %v1337_v20, %v1336_v16 }
 0x15a   :  { %v935_v22 = vadd.f32 %v934_v3, %v904_v18  ;;  %v1170_v23 = vpack.c.bf16 %v1290_v19, %v1287_v8  ;;  %v867_v24 = vadd.f32 %v1290_v19, %v866_v17  ;;  %v905_v25 = vmul.f32 %v1290_v19, %v1290_v19 }
 0x15b   :  { %v1210_v26 = vpack.c.bf16 %v1651_v21, %v1649_v13 }
 0x15c   :  { %1218 = vst [vmem:[#allocation8 + $0x38] sm:$0xff] %v1170_v23   ;;  %v868_v28 = vadd.f32 %v1607_v55, %v867_v24  ;;  %v936_v31 = vadd.f32 %v935_v22, %v905_v25 }
 0x15d   :  { %1226 = vst [vmem:[#allocation8 + $0x78] sm:$0xff] %v1210_v26  }
 0x15e   :  { %v869_v33 = vadd.f32 %v1609_v59, %v868_v28  ;;  %v937_v34 = vadd.f32 %v936_v31, %v906_v27 }
 0x15f   :  { %1483 = shalt.err (!%p1480_p6)
}
 0x160   :  { %s1484_s20 = scalar_lea.hbm %s1752_s2, 2048 }
 0x161   :  { %p1485_p7 = scmp.ne.s32.totalorder %s1752_s2, %s1484_s20  ;;  %p1488_p8 = scmp.lt.u32.totalorder %s1484_s20, %s1752_s2 }
 0x163   :  { %p1490_p9 = pnand %p1488_p8, %p1485_p7 }
 0x165   :  { %1493 = shalt.err (!%p1490_p9)
}
 0x166   :  { %986 = dma.vmem_to_hbm [thread:$0]  %s981_s16, 2048, %s1752_s2, [#allocation5], %s1550_s0, %s1550_s0, %s1551_s13   ;;  %v908_v55 = vmul.f32 %v1613_v9, %v1613_v9  ;;  %v870_v59 = vadd.f32 %v1613_v9, %v869_v33  ;;  %v938_v36 = vadd.f32 %v937_v34, %v907_v32  ;;  %v909_v38 = vmul.f32 %v1615_v15, %v1615_v15 }
 0x167   :  { %v910_v41 = vmul.f32 %v1619_v29, %v1619_v29  ;;  %v911_v44 = vmul.f32 %v1621_v35, %v1621_v35  ;;  %v912_v9 = vmul.f32 %v1625_v49, %v1625_v49  ;;  %v914_v53 = vmul.f32 %v1631_v7, %v1631_v7  ;;  %s1553_s2 = smov [#allocation9]   ;;  %s1554_s28 = smov [#allocation11]  }
 0x168   :  { %v871_v39 = vadd.f32 %v1615_v15, %v870_v59  ;;  %v939_v40 = vadd.f32 %v938_v36, %v908_v55  ;;  %v913_v15 = vmul.f32 %v1627_v56, %v1627_v56  ;;  %v915_v58 = vmul.f32 %v1633_v14, %v1633_v14  ;;  %s993_s27 = sshll.u32 %s1553_s2, 4  ;;  %s1003_s29 = sshll.u32 %s1554_s28, 4  ;;  %s994_s27 = int_to_ptr.vmem [resolvable:$true] %s993_s27  ;;  %s1718_s29 = int_to_ptr.vmem [resolvable:$true] %s1003_s29 }
 0x169   :  { %v916_v62 = vmul.f32 %v1637_v30, %v1637_v30  ;;  %v917_v0 = vmul.f32 %v1639_v37, %v1639_v37  ;;  %v918_v2 = vmul.f32 %v1643_v52, %v1643_v52  ;;  %v919_v4 = vmul.f32 %v1645_v61, %v1645_v61  ;;  %s1494_s30 = scalar_lea.vmem %s994_s27, 16  ;;  %s1498_s5 = scalar_lea.vmem %s994_s27, 32 }
 0x16a   :  { %v940_v42 = vadd.f32 %v939_v40, %v909_v38  ;;  %v872_v43 = vadd.f32 %v1619_v29, %v871_v39  ;;  %v921_v10 = vmul.f32 %v1651_v21, %v1651_v21  ;;  %p1495_p10 = scmp.ne.s32.totalorder %s994_s27, %s1494_s30  ;;  %p1499_p11 = scmp.lt.s32.totalorder %s994_s27, %s994_s27 }
 0x16b   :  { %p1500_p12 = scmp.lt.s32.totalorder %s1498_s5, %s1494_s30 }
 0x16c   :  { %v873_v45 = vadd.f32 %v1621_v35, %v872_v43  ;;  %v941_v46 = vadd.f32 %v940_v42, %v910_v41 }
 0x16d   :  { %p1501_p13 = por %p1500_p12, %p1499_p11 }
 0x16e   :  { %v874_v47 = vadd.f32 %v1625_v49, %v873_v45  ;;  %v942_v48 = vadd.f32 %v941_v46, %v911_v44 }
 0x16f   :  { %p1502_p0 = pnand %p1501_p13, %p1495_p10 }
 0x170   :  { %v875_v50 = vadd.f32 %v1627_v56, %v874_v47  ;;  %v943_v51 = vadd.f32 %v942_v48, %v912_v9 }
 0x172   :  { %v876_v29 = vadd.f32 %v1631_v7, %v875_v50  ;;  %v944_v54 = vadd.f32 %v943_v51, %v913_v15 }
 0x174   :  { %v945_v35 = vadd.f32 %v944_v54, %v914_v53  ;;  %v877_v57 = vadd.f32 %v1633_v14, %v876_v29 }
 0x176   :  { %v946_v49 = vadd.f32 %v945_v35, %v915_v58  ;;  %v878_v60 = vadd.f32 %v1637_v30, %v877_v57  ;;  %v920_v30 = vmul.f32 %v1649_v13, %v1649_v13 }
 0x178   :  { %v947_v56 = vadd.f32 %v946_v49, %v916_v62  ;;  %v879_v63 = vadd.f32 %v1639_v37, %v878_v60 }
 0x17a   :  { %v948_v7 = vadd.f32 %v947_v56, %v917_v0  ;;  %v880_v1 = vadd.f32 %v1643_v52, %v879_v63 }
 0x17c   :  { %v949_v3 = vadd.f32 %v948_v7, %v918_v2  ;;  %v881_v14 = vadd.f32 %v1645_v61, %v880_v1 }
 0x17e   :  { %v950_v5 = vadd.f32 %v949_v3, %v919_v4  ;;  %v882_v6 = vadd.f32 %v1649_v13, %v881_v14 }
 0x180   :  { %v951_v8 = vadd.f32 %v950_v5, %v920_v30  ;;  %v883_v37 = vadd.f32 %v1651_v21, %v882_v6 }
 0x182   :  { %v884_v11 = vrot.slane %v883_v37, 4  ;;  %v952_v52 = vadd.f32 %v951_v8, %v921_v10 }
 0x184   :  { %v885_v12 = vadd.f32 %v884_v11, %v883_v37  ;;  %v953_v16 = vrot.slane %v952_v52, 4 }
 0x186   :  { %v954_v17 = vadd.f32 %v953_v16, %v952_v52  ;;  %v886_v18 = vrot.slane %v885_v12, 2 }
 0x188   :  { %v887_v19 = vadd.f32 %v886_v18, %v885_v12  ;;  %v955_v61 = vrot.slane %v954_v17, 2 }
 0x18a   :  { %v888_v20 = vrot.slane %v887_v19, 1  ;;  %v956_v22 = vadd.f32 %v955_v61, %v954_v17 }
 0x18c   :  { %v889_v13 = vadd.f32 %v888_v20, %v887_v19  ;;  %v957_v23 = vrot.slane %v956_v22, 1 }
 0x18e   :  { %963 = vst [vmem:[#allocation9] sm:$0x1] %v889_v13  ;;  %v958_v24 = vadd.f32 %v957_v23, %v956_v22 }
 0x18f   :  { %1505 = shalt.err (!%p1502_p0)
}
 0x190   :  { %s1506_s8 = scalar_lea.hbm %s1753_s3, 16 }
 0x191   :  { %p1507_p1 = scmp.ne.s32.totalorder %s1753_s3, %s1506_s8  ;;  %p1510_p2 = scmp.lt.u32.totalorder %s1506_s8, %s1753_s3 }
 0x193   :  { %p1512_p3 = pnand %p1510_p2, %p1507_p1 }
 0x195   :  { %1515 = shalt.err (!%p1512_p3)
}
 0x196   :  { %996 = dma.vmem_to_hbm [thread:$0]  %s994_s27, 16, %s1753_s3, [#allocation10]   ;;  %964 = vst [vmem:[#allocation11] sm:$0x1] %v958_v24 }
 0x197   :  { %s1516_s14 = scalar_lea.vmem %s1718_s29, 16  ;;  %s1520_s15 = scalar_lea.vmem %s1718_s29, 32 }
 0x198   :  { %p1517_p4 = scmp.ne.s32.totalorder %s1718_s29, %s1516_s14  ;;  %p1521_p5 = scmp.lt.s32.totalorder %s1718_s29, %s1718_s29 }
 0x199   :  { %p1522_p6 = scmp.lt.s32.totalorder %s1520_s15, %s1516_s14 }
 0x19b   :  { %p1523_p7 = por %p1522_p6, %p1521_p5 }
 0x19d   :  { %p1524_p8 = pnand %p1523_p7, %p1517_p4 }
 0x19f   :  { %1527 = shalt.err (!%p1524_p8)
}
 0x1a0   :  { %s1528_s17 = scalar_lea.hbm %s1754_s4, 16 }
 0x1a1   :  { %p1529_p9 = scmp.ne.s32.totalorder %s1754_s4, %s1528_s17  ;;  %p1532_p10 = scmp.lt.u32.totalorder %s1528_s17, %s1754_s4 }
 0x1a3   :  { %p1534_p11 = pnand %p1532_p10, %p1529_p9 }
 0x1a5   :  { %1537 = shalt.err (!%p1534_p11)
}
 0x1a6   :  { %1006 = dma.vmem_to_hbm [thread:$0]  %s1718_s29, 16, %s1754_s4, [#allocation10]  }
 0x1a7   :  { %1542 = dma.done.wait [#allocation5], 2048  }
 0x1a8   :  { %1543 = vsyncadd [#allocation5], 4294965248 }
 0x1a9   :  { %1544 = dma.done.wait [#allocation10], 32  }
 0x1aa   :  { %1545 = vsyncadd [#allocation10], 4294967264 }
 0x1ab   :  { %1016 = vsyncpa [#allocation4], 1 }
 0x1ac   :  { %1017 = vsyncpa [#allocation7], 1 }
 0x1ad   :  { %1018 = vsyncpa [#allocation5], 1 }
 0x1ae   :  { %1019 = vsyncpa [#allocation10], 1 }

</bundles_post_ra>
